<compile_context>
chip_gen: v6e
topology: v6e:2x2x1
jax: 0.10.0
libtpu: 0.0.40
codegen_flags: <defaults>
</compile_context>

<pallas_src>
import jax
import jax.numpy as jnp
from jax.experimental import pallas as pl
from jax.experimental.pallas import tpu as pltpu

LATENT_DIM = 100
NUM_CLASSES = 10
K1 = 128                     # packed layer-1 K: [noise(100) | one-hot(10) | pad(18)]
H1, H2 = 128, 256
OUT = 784                    # 28 * 28
OUT_PAD = 1024               # 8 * 128 -> two lane-dense 512 tiles (v7x split only)
BN_EPS = 1e-5


def _make_kernel(b_real, b_pad):
    """Kernel closure over the static real / padded batch sizes."""

    def kernel(labels_ref, x_ref, w1_ref, vec_ref, w2_ref, w3_ref, b3_ref, out_ref):
        # ---- assemble packed layer-1 input: one-hot written into cols 100..109 ----
        labels = labels_ref[...]                                    # (b_pad, 1) i32
        lane = jax.lax.broadcasted_iota(jnp.int32, (b_pad, K1), 1)
        xv = x_ref[...]                                             # bf16; cols >=100 are 0
        x = jnp.where(lane == labels + LATENT_DIM, jnp.ones_like(xv), xv)

        # packed (1, 640) vector = [b1 | gamma | beta], static lane-aligned slices
        b1 = vec_ref[:, :H1]
        gamma = vec_ref[:, H1:H1 + H2]
        beta = vec_ref[:, H1 + H2:H1 + 2 * H2]

        # ---- Linear(110 -> 128) with folded embedding: one bf16 MXU dot ----
        h1 = jnp.dot(x, w1_ref[...], preferred_element_type=jnp.float32) + b1
        h1 = jnp.where(h1 > 0, h1, 0.2 * h1)                        # LeakyReLU(0.2)

        # ---- Linear(128 -> 256); bias omitted (cancels in training-mode BN) ----
        h2 = jnp.dot(h1.astype(jnp.bfloat16), w2_ref[...],
                     preferred_element_type=jnp.float32)

        # ---- BatchNorm1d(256), training mode (biased var), centered f32 stats ----
        inv_n = 1.0 / b_real
        if b_real == b_pad:
            mean = jnp.sum(h2, axis=0, keepdims=True) * inv_n
            d = h2 - mean
        else:
            # mask padded rows out of the statistics (exact match to unpadded batch)
            row = jax.lax.broadcasted_iota(jnp.int32, (b_pad, 1), 0)
            valid = (row < b_real).astype(jnp.float32)
            mean = jnp.sum(h2 * valid, axis=0, keepdims=True) * inv_n
            d = (h2 - mean) * valid
        var = jnp.sum(d * d, axis=0, keepdims=True) * inv_n
        h2 = (h2 - mean) * jax.lax.rsqrt(var + BN_EPS)
        h2 = h2 * gamma + beta
        h2 = jnp.where(h2 > 0, h2, 0.2 * h2)                        # LeakyReLU(0.2)

        # ---- Linear(256 -> output tile) + Tanh (f32) ----
        h3 = jnp.dot(h2.astype(jnp.bfloat16), w3_ref[...],
                     preferred_element_type=jnp.float32) + b3_ref[...]
        out_ref[...] = jnp.tanh(h3)

    return kernel


def init_params(key):
    """Deterministic init mirroring the PyTorch module's shapes / init scheme."""
    ks = jax.random.split(key, 7)

    def linear(kw, kb, fan_in, fan_out):
        bound = 1.0 / float(fan_in) ** 0.5
        w = jax.random.uniform(kw, (fan_in, fan_out), jnp.float32, -bound, bound)
        b = jax.random.uniform(kb, (1, fan_out), jnp.float32, -bound, bound)
        return w, b

    emb = jax.random.normal(ks[0], (NUM_CLASSES, NUM_CLASSES), jnp.float32)
    w1, b1 = linear(ks[1], ks[2], LATENT_DIM + NUM_CLASSES, H1)
    w2, _b2 = linear(ks[3], ks[4], H1, H2)       # b2 unused: cancels in BatchNorm
    w3, b3 = linear(ks[5], ks[6], H2, OUT)

    # Fold the embedding table into the label rows of W1 and pad K to 128.
    w1p = jnp.zeros((K1, H1), jnp.float32)
    w1p = w1p.at[:LATENT_DIM].set(w1[:LATENT_DIM])
    w1p = w1p.at[LATENT_DIM:LATENT_DIM + NUM_CLASSES].set(emb @ w1[LATENT_DIM:])

    # Pack the small per-feature vectors: [b1 (128) | gamma (256) | beta (256)].
    vec1 = jnp.concatenate(
        [b1, jnp.ones((1, H2), jnp.float32), jnp.zeros((1, H2), jnp.float32)], axis=1)

    return dict(
        w1=w1p.astype(jnp.bfloat16),             # bf16 (128, 128), emb folded in
        vec1=vec1,                               # f32  (1, 640)
        w2=w2.astype(jnp.bfloat16),              # bf16 (128, 256)
        w3=w3.astype(jnp.bfloat16),              # bf16 (256, 784)
        b3=b3,                                   # f32  (1, 784)
    )


def _num_tensorcores() -> int:
    # Best-effort: v7x has 2 TensorCores per chip; fall back to 1 if unknown.
    try:
        return max(1, int(getattr(jax.devices()[0], "num_cores", 1)))
    except Exception:
        return 1


@jax.jit
def generator_forward(params, noise, labels):
    b_real = noise.shape[0]
    b_pad = -(-b_real // 8) * 8                  # sublane-aligned batch

    # Packed bf16 layer-1 input: [noise | zeros]; one-hot cols filled in-kernel.
    x = jnp.zeros((b_pad, K1), jnp.bfloat16).at[:b_real, :LATENT_DIM].set(
        noise.astype(jnp.bfloat16))
    labels2d = jnp.zeros((b_pad, 1), jnp.int32).at[:b_real, 0].set(
        labels.astype(jnp.int32))

    # 2-way column split only where it pays: multi-TC chips (v7x) AND a batch
    # large enough that per-core layer-3 work beats per-step overhead.
    # Single-TC v5e/v6e and small batches run one grid step (no recompute).
    n_tiles = 2 if (b_pad >= 256 and _num_tensorcores() >= 2) else 1

    if n_tiles == 1:
        out_cols = OUT                           # write 784 directly: no slice copy
        w3, b3 = params["w3"], params["b3"]
    else:
        out_cols = OUT_PAD                       # 1024 -> two lane-dense 512 tiles
        w3 = jnp.zeros((H2, OUT_PAD), jnp.bfloat16).at[:, :OUT].set(params["w3"])
        b3 = jnp.zeros((1, OUT_PAD), jnp.float32).at[:, :OUT].set(params["b3"])
    tile_n = out_cols // n_tiles

    def full(shape):
        return pl.BlockSpec(shape, lambda j: (0, 0))

    grid_spec = pltpu.PrefetchScalarGridSpec(
        num_scalar_prefetch=0,
        grid=(n_tiles,),
        in_specs=[
            full((b_pad, 1)),                                 # labels
            full((b_pad, K1)),                                # packed noise (bf16)
            full((K1, H1)),                                   # W1 (embedding folded)
            full((1, H1 + 2 * H2)),                           # [b1 | gamma | beta]
            full((H1, H2)),                                   # W2
            pl.BlockSpec((H2, tile_n), lambda j: (0, j)),     # W3 column tile
            pl.BlockSpec((1, tile_n), lambda j: (0, j)),      # b3 column tile
        ],
        out_specs=pl.BlockSpec((b_pad, tile_n), lambda j: (0, j)),
    )

    out = pl.pallas_call(
        _make_kernel(b_real, b_pad),
        out_shape=jax.ShapeDtypeStruct((b_pad, out_cols), jnp.float32),
        grid_spec=grid_spec,
        compiler_params=pltpu.CompilerParams(
            dimension_semantics=("parallel",)),               # megacore split on v7x
    )(labels2d, x, params["w1"], params["vec1"], params["w2"], w3, b3)

    return out[:b_real, :OUT].reshape(b_real, 1, 28, 28)      # NCHW (B, 1, 28, 28)


if __name__ == "__main__":
    key = jax.random.PRNGKey(0)
    k_param, k_noise, k_label = jax.random.split(key, 3)

    B = 4
    params = init_params(k_param)
    noise = jax.random.normal(k_noise, (B, LATENT_DIM), jnp.float32)
    labels = jax.random.randint(k_label, (B,), 0, NUM_CLASSES, jnp.int32)

    img = generator_forward(params, noise, labels)
    jax.block_until_ready(img)

    assert img.shape == (B, 1, 28, 28)
    assert bool(jnp.all(jnp.isfinite(img)))
    assert bool(jnp.all(jnp.abs(img) <= 1.0))                 # tanh range
    print("KERNEL_OK")
</pallas_src>

<mosaic_0001>
module attributes {stable_mosaic.version = 11 : i64} {
  func.func @kernel(%arg0: i32, %arg1: memref<8x1xi32, #tpu.memory_space<vmem>>, %arg2: memref<8x128xbf16, #tpu.memory_space<vmem>>, %arg3: memref<128x128xbf16, #tpu.memory_space<vmem>>, %arg4: memref<1x640xf32, #tpu.memory_space<vmem>>, %arg5: memref<128x256xbf16, #tpu.memory_space<vmem>>, %arg6: memref<256x784xbf16, #tpu.memory_space<vmem>>, %arg7: memref<1x784xf32, #tpu.memory_space<vmem>>, %arg8: memref<8x784xf32, #tpu.memory_space<vmem>>) attributes {dimension_semantics = [#tpu.dimension_semantics<parallel>], iteration_bounds = array<i64: 1>, scalar_prefetch = 0 : i64, scratch_operands = 0 : i64, tpu.core_type = #tpu.core_type<tc>, window_params = [{pipeline_mode = #tpu.pipeline_mode<synchronous>, transform_indices = @transform_0, window_bounds = array<i64: 8, 1>}, {pipeline_mode = #tpu.pipeline_mode<synchronous>, transform_indices = @transform_1, window_bounds = array<i64: 8, 128>}, {pipeline_mode = #tpu.pipeline_mode<synchronous>, transform_indices = @transform_2, window_bounds = array<i64: 128, 128>}, {pipeline_mode = #tpu.pipeline_mode<synchronous>, transform_indices = @transform_3, window_bounds = array<i64: 1, 640>}, {pipeline_mode = #tpu.pipeline_mode<synchronous>, transform_indices = @transform_4, window_bounds = array<i64: 128, 256>}, {transform_indices = @transform_5, window_bounds = array<i64: 256, 784>}, {transform_indices = @transform_6, window_bounds = array<i64: 1, 784>}, {transform_indices = @transform_7, window_bounds = array<i64: 8, 784>}]} {
    %c0 = arith.constant 0 : index
    %c0_0 = arith.constant 0 : index
    %0 = vector.load %arg1[%c0, %c0_0] : memref<8x1xi32, #tpu.memory_space<vmem>>, vector<8x1xi32>
    %1 = tpu.iota {dimensions = array<i32: 1>} : vector<8x128xi32>
    %c0_1 = arith.constant 0 : index
    %c0_2 = arith.constant 0 : index
    %2 = vector.load %arg2[%c0_1, %c0_2] : memref<8x128xbf16, #tpu.memory_space<vmem>>, vector<8x128xbf16>
    %c100_i32 = arith.constant 100 : i32
    %3 = vector.broadcast %c100_i32 : i32 to vector<8x1xi32>
    %4 = arith.addi %0, %3 : vector<8x1xi32>
    %5 = vector.broadcast %4 : vector<8x1xi32> to vector<8x128xi32>
    %6 = arith.cmpi eq, %1, %5 : vector<8x128xi32>
    %cst = arith.constant 1.000000e+00 : bf16
    %7 = vector.broadcast %cst : bf16 to vector<8x128xbf16>
    %8 = arith.select %6, %7, %2 : vector<8x128xi1>, vector<8x128xbf16>
    %c0_3 = arith.constant 0 : index
    %c0_4 = arith.constant 0 : index
    %9 = vector.load %arg4[%c0_3, %c0_4] : memref<1x640xf32, #tpu.memory_space<vmem>>, vector<1x128xf32>
    %c0_5 = arith.constant 0 : index
    %c128 = arith.constant 128 : index
    %10 = vector.load %arg4[%c0_5, %c128] : memref<1x640xf32, #tpu.memory_space<vmem>>, vector<1x256xf32>
    %c0_6 = arith.constant 0 : index
    %c384 = arith.constant 384 : index
    %11 = vector.load %arg4[%c0_6, %c384] : memref<1x640xf32, #tpu.memory_space<vmem>>, vector<1x256xf32>
    %c0_7 = arith.constant 0 : index
    %c0_8 = arith.constant 0 : index
    %12 = vector.load %arg3[%c0_7, %c0_8] : memref<128x128xbf16, #tpu.memory_space<vmem>>, vector<128x128xbf16>
    %cst_9 = arith.constant dense<0.000000e+00> : vector<8x128xf32>
    %13 = tpu.matmul %8, %12, %cst_9 {dimension_numbers = #tpu.dot_dimension_numbers<[1], [0], [0], [1], [0, 0, 1, 1], [], []>} : vector<8x128xbf16>, vector<128x128xbf16>, vector<8x128xf32> -> vector<8x128xf32>
    %14 = vector.broadcast %9 : vector<1x128xf32> to vector<8x128xf32>
    %15 = arith.addf %13, %14 : vector<8x128xf32>
    %cst_10 = arith.constant 0.000000e+00 : f32
    %16 = vector.broadcast %cst_10 : f32 to vector<8x128xf32>
    %17 = arith.cmpf ogt, %15, %16 : vector<8x128xf32>
    %cst_11 = arith.constant 2.000000e-01 : f32
    %18 = vector.broadcast %cst_11 : f32 to vector<8x128xf32>
    %19 = arith.mulf %18, %15 : vector<8x128xf32>
    %20 = arith.select %17, %15, %19 : vector<8x128xi1>, vector<8x128xf32>
    %21 = arith.truncf %20 : vector<8x128xf32> to vector<8x128xbf16>
    %c0_12 = arith.constant 0 : index
    %c0_13 = arith.constant 0 : index
    %22 = vector.load %arg5[%c0_12, %c0_13] : memref<128x256xbf16, #tpu.memory_space<vmem>>, vector<128x256xbf16>
    %cst_14 = arith.constant dense<0.000000e+00> : vector<8x256xf32>
    %23 = tpu.matmul %21, %22, %cst_14 {dimension_numbers = #tpu.dot_dimension_numbers<[1], [0], [0], [1], [0, 0, 1, 1], [], []>} : vector<8x128xbf16>, vector<128x256xbf16>, vector<8x256xf32> -> vector<8x256xf32>
    %24 = tpu.iota {dimensions = array<i32: 0>} : vector<8x1xi32>
    %c4_i32 = arith.constant 4 : i32
    %25 = vector.broadcast %c4_i32 : i32 to vector<8x1xi32>
    %26 = arith.cmpi slt, %24, %25 : vector<8x1xi32>
    %27 = arith.extui %26 : vector<8x1xi1> to vector<8x1xi32>
    %28 = arith.sitofp %27 : vector<8x1xi32> to vector<8x1xf32>
    %29 = vector.broadcast %28 : vector<8x1xf32> to vector<8x256xf32>
    %30 = arith.mulf %23, %29 : vector<8x256xf32>
    %cst_15 = arith.constant dense<0.000000e+00> : vector<256xf32>
    %31 = vector.multi_reduction <add>, %30, %cst_15 [0] : vector<8x256xf32> to vector<256xf32>
    %32 = vector.shape_cast %31 : vector<256xf32> to vector<1x256xf32>
    %cst_16 = arith.constant 2.500000e-01 : f32
    %33 = vector.broadcast %cst_16 : f32 to vector<1x256xf32>
    %34 = arith.mulf %32, %33 : vector<1x256xf32>
    %35 = vector.broadcast %34 : vector<1x256xf32> to vector<8x256xf32>
    %36 = arith.subf %23, %35 : vector<8x256xf32>
    %37 = vector.broadcast %28 : vector<8x1xf32> to vector<8x256xf32>
    %38 = arith.mulf %36, %37 : vector<8x256xf32>
    %39 = arith.mulf %38, %38 : vector<8x256xf32>
    %cst_17 = arith.constant dense<0.000000e+00> : vector<256xf32>
    %40 = vector.multi_reduction <add>, %39, %cst_17 [0] : vector<8x256xf32> to vector<256xf32>
    %41 = vector.shape_cast %40 : vector<256xf32> to vector<1x256xf32>
    %cst_18 = arith.constant 2.500000e-01 : f32
    %42 = vector.broadcast %cst_18 : f32 to vector<1x256xf32>
    %43 = arith.mulf %41, %42 : vector<1x256xf32>
    %44 = vector.broadcast %34 : vector<1x256xf32> to vector<8x256xf32>
    %45 = arith.subf %23, %44 : vector<8x256xf32>
    %cst_19 = arith.constant 9.99999974E-6 : f32
    %46 = vector.broadcast %cst_19 : f32 to vector<1x256xf32>
    %47 = arith.addf %43, %46 : vector<1x256xf32>
    %48 = math.rsqrt %47 : vector<1x256xf32>
    %49 = vector.broadcast %48 : vector<1x256xf32> to vector<8x256xf32>
    %50 = arith.mulf %45, %49 : vector<8x256xf32>
    %51 = vector.broadcast %10 : vector<1x256xf32> to vector<8x256xf32>
    %52 = arith.mulf %50, %51 : vector<8x256xf32>
    %53 = vector.broadcast %11 : vector<1x256xf32> to vector<8x256xf32>
    %54 = arith.addf %52, %53 : vector<8x256xf32>
    %cst_20 = arith.constant 0.000000e+00 : f32
    %55 = vector.broadcast %cst_20 : f32 to vector<8x256xf32>
    %56 = arith.cmpf ogt, %54, %55 : vector<8x256xf32>
    %cst_21 = arith.constant 2.000000e-01 : f32
    %57 = vector.broadcast %cst_21 : f32 to vector<8x256xf32>
    %58 = arith.mulf %57, %54 : vector<8x256xf32>
    %59 = arith.select %56, %54, %58 : vector<8x256xi1>, vector<8x256xf32>
    %60 = arith.truncf %59 : vector<8x256xf32> to vector<8x256xbf16>
    %c0_22 = arith.constant 0 : index
    %c0_23 = arith.constant 0 : index
    %61 = vector.load %arg6[%c0_22, %c0_23] : memref<256x784xbf16, #tpu.memory_space<vmem>>, vector<256x784xbf16>
    %cst_24 = arith.constant dense<0.000000e+00> : vector<8x784xf32>
    %62 = tpu.matmul %60, %61, %cst_24 {dimension_numbers = #tpu.dot_dimension_numbers<[1], [0], [0], [1], [0, 0, 1, 1], [], []>} : vector<8x256xbf16>, vector<256x784xbf16>, vector<8x784xf32> -> vector<8x784xf32>
    %c0_25 = arith.constant 0 : index
    %c0_26 = arith.constant 0 : index
    %63 = vector.load %arg7[%c0_25, %c0_26] : memref<1x784xf32, #tpu.memory_space<vmem>>, vector<1x784xf32>
    %64 = vector.broadcast %63 : vector<1x784xf32> to vector<8x784xf32>
    %65 = arith.addf %62, %64 : vector<8x784xf32>
    %66 = math.tanh %65 : vector<8x784xf32>
    %c0_27 = arith.constant 0 : index
    %c0_28 = arith.constant 0 : index
    %67 = vector.load %arg8[%c0_27, %c0_28] : memref<8x784xf32, #tpu.memory_space<vmem>>, vector<8x784xf32>
    tpu.vector_store %arg8[%c0_27, %c0_28], %66 {strides = array<i32>} : memref<8x784xf32, #tpu.memory_space<vmem>>, vector<8x784xf32>,
    return
  }
  func.func @transform_0(%arg0: i32) -> (i32, i32) {
    %c0_i32 = arith.constant 0 : i32
    %c0_i32_0 = arith.constant 0 : i32
    %c0_i32_1 = arith.constant 0 : i32
    return %c0_i32, %c0_i32_0 : i32, i32
  }
  func.func @transform_1(%arg0: i32) -> (i32, i32) {
    %c0_i32 = arith.constant 0 : i32
    %c0_i32_0 = arith.constant 0 : i32
    %c0_i32_1 = arith.constant 0 : i32
    return %c0_i32, %c0_i32_0 : i32, i32
  }
  func.func @transform_2(%arg0: i32) -> (i32, i32) {
    %c0_i32 = arith.constant 0 : i32
    %c0_i32_0 = arith.constant 0 : i32
    %c0_i32_1 = arith.constant 0 : i32
    return %c0_i32, %c0_i32_0 : i32, i32
  }
  func.func @transform_3(%arg0: i32) -> (i32, i32) {
    %c0_i32 = arith.constant 0 : i32
    %c0_i32_0 = arith.constant 0 : i32
    %c0_i32_1 = arith.constant 0 : i32
    return %c0_i32, %c0_i32_0 : i32, i32
  }
  func.func @transform_4(%arg0: i32) -> (i32, i32) {
    %c0_i32 = arith.constant 0 : i32
    %c0_i32_0 = arith.constant 0 : i32
    %c0_i32_1 = arith.constant 0 : i32
    return %c0_i32, %c0_i32_0 : i32, i32
  }
  func.func @transform_5(%arg0: i32) -> (i32, i32) {
    %c0_i32 = arith.constant 0 : i32
    %c0_i32_0 = arith.constant 0 : i32
    return %c0_i32, %arg0 : i32, i32
  }
  func.func @transform_6(%arg0: i32) -> (i32, i32) {
    %c0_i32 = arith.constant 0 : i32
    %c0_i32_0 = arith.constant 0 : i32
    return %c0_i32, %arg0 : i32, i32
  }
  func.func @transform_7(%arg0: i32) -> (i32, i32) {
    %c0_i32 = arith.constant 0 : i32
    %c0_i32_0 = arith.constant 0 : i32
    return %c0_i32, %arg0 : i32, i32
  }
}

</mosaic_0001>

<bundles_post_ra>
// kernel: generator_forward.1
= control target key start
LH: loop header
LB: loop body
LE: loop exit
PB: predicated region body
PF: predicated region fallthrough
CT: control target
= control target key end

     0   :  { %v1700_v0 = vmov 0   ;;  %v1701_v2 = vmov 0.0   ;;  %vm1702_vm0 = vmmov 0   ;;  %v29_v24 = vlaneseq  ;;  %s2228_s0 = inlined_call_operand.vmem [shape: s32[8,1], index: 0, kind: input, shape index: {}]   ;;  %s2229_s2 = inlined_call_operand.vmem [shape: bf16[128,128], index: 2, kind: input, shape index: {}]   ;;  %s2230_s4 = inlined_call_operand.vmem [shape: bf16[128,256], index: 4, kind: input, shape index: {}]   ;;  %s2231_s1 = inlined_call_operand.vmem [shape: bf16[8,128], index: 1, kind: input, shape index: {}]   ;;  %s2232_s3 = inlined_call_operand.vmem [shape: f32[1,640], index: 3, kind: input, shape index: {}]   ;;  %s2233_s5 = inlined_call_operand.vmem [shape: bf16[256,784], index: 5, kind: input, shape index: {}]   ;;  %s2234_s6 = inlined_call_operand.vmem [shape: f32[1,784], index: 6, kind: input, shape index: {}]   ;;  %s2235_s7 = inlined_call_operand.vmem [shape: f32[8,784], index: 7, kind: output, shape index: {}]  }
   0x1   :  { %1489 = vset.pattern.permute.xlu0 %v1700_v0  ;;  %v28_v1 = vld [vmem:[%s2228_s0] sm:$0xff]  ;;  %1466 = vmatprep.subr.bf16.mxu0 %v1701_v2  ;;  %v1490_v4 = vld [vmem:[%s2229_s2 + $0x38] sm:$0xff]   ;;  %v1491_v5 = vld [vmem:[%s2229_s2 + $0x30] sm:$0xff]   ;;  %vm1291_vm7 = vcmask 130048  }
   0x2   :  { %v32_v3 = vadd.s32 100, %v28_v1  ;;  %1482 = vmatprep.mubr.msk.bf16.mxu0 %vm1702_vm0, %v1701_v2  ;;  %284 = vmatprep.mubr.bf16.mxu1 %v1700_v0  ;;  %v1492_v6 = vld [vmem:[%s2229_s2 + $0x28] sm:$0xff]   ;;  %v1498_v7 = vld [vmem:[%s2230_s4 + $0x74] ss:$8 sps:$4 sm:$0xff]   ;;  %v1500_v8 = vld [vmem:[%s2230_s4 + $0x70] ss:$8 sps:$4 sm:$0xff]  }
   0x3   :  { %1467 = vmatpush3.bf16.msra.mxu0 %v1490_v4  ;;  %v1501_v9 = vld [vmem:[%s2230_s4 + $0x64] ss:$8 sps:$4 sm:$0xff]   ;;  %252 = vmatprep.subr.bf16.mxu1 %v1498_v7  ;;  %v1503_v11 = vld [vmem:[%s2230_s4 + $0x60] ss:$8 sps:$4 sm:$0xff]   ;;  %v1504_v12 = vld [vmem:[%s2230_s4 + $0x54] ss:$8 sps:$4 sm:$0xff]  }
   0x4   :  { %34 = vperm.xlu0 %1489, %v32_v3   ;;  %1468 = vmatprep.subr.bf16.mxu0 %v1701_v2  ;;  %v1493_v10 = vld [vmem:[%s2229_s2 + $0x20] sm:$0xff]   ;;  %v1494_v13 = vld [vmem:[%s2229_s2 + $0x18] sm:$0xff]   ;;  %v1495_v16 = vld [vmem:[%s2229_s2 + $0x10] sm:$0xff]   ;;  %v30_v25 = vand.u32 127, %v29_v24 }
   0x5   :  { %253 = vmatpush1.bf16.msra.mxu1 %v1500_v8  ;;  %v1506_v14 = vld [vmem:[%s2230_s4 + $0x50] ss:$8 sps:$4 sm:$0xff]   ;;  %v1507_v15 = vld [vmem:[%s2230_s4 + $0x44] ss:$8 sps:$4 sm:$0xff]   ;;  %v1509_v17 = vld [vmem:[%s2230_s4 + $0x40] ss:$8 sps:$4 sm:$0xff]  }
   0x6   :  { %254 = vmatprep.subr.bf16.mxu1 %v1501_v9  ;;  %v1510_v18 = vld [vmem:[%s2230_s4 + $0x34] ss:$8 sps:$4 sm:$0xff]   ;;  %v1496_v19 = vld [vmem:[%s2229_s2 + $0x8] sm:$0xff]   ;;  %v1512_v20 = vld [vmem:[%s2230_s4 + $0x30] ss:$8 sps:$4 sm:$0xff]  }
   0x7   :  { %1469 = vmatpush3.bf16.msra.mxu0 %v1491_v5  ;;  %v1513_v21 = vld [vmem:[%s2230_s4 + $0x24] ss:$8 sps:$4 sm:$0xff]   ;;  %v1515_v23 = vld [vmem:[%s2230_s4 + $0x20] ss:$8 sps:$4 sm:$0xff]   ;;  %v1516_v29 = vld [vmem:[%s2230_s4 + $0x14] ss:$8 sps:$4 sm:$0xff]  }
   0x8   :  { %1470 = vmatprep.subr.bf16.mxu0 %v1701_v2  ;;  %v1497_v22 = vld [vmem:[%s2229_s2] sm:$0xff]   ;;  %v1518_v30 = vld [vmem:[%s2230_s4 + $0x10] ss:$8 sps:$4 sm:$0xff]   ;;  %v1524_v42 = vld [vmem:[%s2233_s5 + $0x18c] ss:$28 sps:$4 sm:$0xff]  }
   0x9   :  { %255 = vmatpush1.bf16.msra.mxu1 %v1503_v11  ;;  %v31_v27 = vld [vmem:[%s2231_s1] sm:$0xf]  ;;  %v1519_v31 = vld [vmem:[%s2230_s4 + $0x4] ss:$8 sps:$4 sm:$0xff]   ;;  %v1527_v45 = vld [vmem:[%s2233_s5 + $0x194] ss:$28 sps:$4 sm:$0xff]  }
   0xa   :  { %256 = vmatprep.subr.bf16.mxu1 %v1504_v12  ;;  %v1521_v32 = vld [vmem:[%s2230_s4] ss:$8 sps:$4 sm:$0xff]   ;;  %v1525_v44 = vld [vmem:[%s2233_s5 + $0x190] ss:$28 sps:$4 sm:$0xff]   ;;  %v1533_v47 = vld [vmem:[%s2233_s5 + $0x15c] ss:$28 sps:$4 sm:$0xff]  }
   0xb   :  { %1471 = vmatpush3.bf16.msra.mxu0 %v1492_v6  ;;  %v1297_v33 = vld [vmem:[%s2232_s3] ss:$0 sm:$0xff]  ;;  %v1522_v43 = vld [vmem:[%s2233_s5 + $0x188] ss:$28 sps:$4 sm:$0xff]   ;;  %v1530_v46 = vld [vmem:[%s2233_s5 + $0x154] ss:$28 sps:$4 sm:$0xff]  }
   0xc   :  { %1472 = vmatprep.subr.bf16.mxu0 %v1701_v2  ;;  %v1528_v48 = vld [vmem:[%s2233_s5 + $0x150] ss:$28 sps:$4 sm:$0xff]   ;;  %v1531_v49 = vld [vmem:[%s2233_s5 + $0x158] ss:$28 sps:$4 sm:$0xff]   ;;  %v1539_v51 = vld [vmem:[%s2233_s5 + $0x124] ss:$28 sps:$4 sm:$0xff]  }
   0xd   :  { %257 = vmatpush1.bf16.msra.mxu1 %v1506_v14  ;;  %v1536_v50 = vld [vmem:[%s2233_s5 + $0x11c] ss:$28 sps:$4 sm:$0xff]   ;;  %v1542_v54 = vld [vmem:[%s2233_s5 + $0xe4] ss:$28 sps:$4 sm:$0xff]   ;;  %v1545_v55 = vld [vmem:[%s2233_s5 + $0xec] ss:$28 sps:$4 sm:$0xff]  }
   0xe   :  { %258 = vmatprep.subr.bf16.mxu1 %v1507_v15  ;;  %v1534_v52 = vld [vmem:[%s2233_s5 + $0x118] ss:$28 sps:$4 sm:$0xff]   ;;  %v1537_v53 = vld [vmem:[%s2233_s5 + $0x120] ss:$28 sps:$4 sm:$0xff]   ;;  %v1543_v57 = vld [vmem:[%s2233_s5 + $0xe8] ss:$28 sps:$4 sm:$0xff]  }
   0xf   :  { %1473 = vmatpush3.bf16.msra.mxu0 %v1493_v10  ;;  %v1540_v56 = vld [vmem:[%s2233_s5 + $0xe0] ss:$28 sps:$4 sm:$0xff]   ;;  %v1548_v58 = vld [vmem:[%s2233_s5 + $0xac] ss:$28 sps:$4 sm:$0xff]   ;;  %v1551_v59 = vld [vmem:[%s2233_s5 + $0xb4] ss:$28 sps:$4 sm:$0xff]  }
  0x10   :  { %1474 = vmatprep.subr.bf16.mxu0 %v1701_v2  ;;  %v1546_v60 = vld [vmem:[%s2233_s5 + $0xa8] ss:$28 sps:$4 sm:$0xff]   ;;  %v1549_v61 = vld [vmem:[%s2233_s5 + $0xb0] ss:$28 sps:$4 sm:$0xff]   ;;  %v1557_v63 = vld [vmem:[%s2233_s5 + $0x7c] ss:$28 sps:$4 sm:$0xff]  }
  0x11   :  { %259 = vmatpush1.bf16.msra.mxu1 %v1509_v17  ;;  %v1554_v62 = vld [vmem:[%s2233_s5 + $0x74] ss:$28 sps:$4 sm:$0xff]   ;;  %v1560_v3 = vld [vmem:[%s2233_s5 + $0x3c] ss:$28 sps:$4 sm:$0xff]   ;;  %v1563_v4 = vld [vmem:[%s2233_s5 + $0x44] ss:$28 sps:$4 sm:$0xff]  }
  0x12   :  { %260 = vmatprep.subr.bf16.mxu1 %v1510_v18  ;;  %v1552_v0 = vld [vmem:[%s2233_s5 + $0x70] ss:$28 sps:$4 sm:$0xff]   ;;  %v1555_v1 = vld [vmem:[%s2233_s5 + $0x78] ss:$28 sps:$4 sm:$0xff]   ;;  %v1561_v6 = vld [vmem:[%s2233_s5 + $0x40] ss:$28 sps:$4 sm:$0xff]  }
  0x13   :  { %1475 = vmatpush3.bf16.msra.mxu0 %v1494_v13  ;;  %v1558_v5 = vld [vmem:[%s2233_s5 + $0x38] ss:$28 sps:$4 sm:$0xff]   ;;  %v1566_v7 = vld [vmem:[%s2233_s5 + $0x4] ss:$28 sps:$4 sm:$0xff]   ;;  %v1569_v8 = vld [vmem:[%s2233_s5 + $0xc] ss:$28 sps:$4 sm:$0xff]  }
  0x14   :  { %1476 = vmatprep.subr.bf16.mxu0 %v1701_v2  ;;  %v1564_v9 = vld [vmem:[%s2233_s5] ss:$28 sps:$4 sm:$0xff]   ;;  %v1567_v10 = vld [vmem:[%s2233_s5 + $0x8] ss:$28 sps:$4 sm:$0xff]   ;;  %v1575_v12 = vld [vmem:[%s2233_s5 + $0x354] ss:$28 sps:$4 sm:$0xff]  }
  0x15   :  { %261 = vmatpush1.bf16.msra.mxu1 %v1512_v20  ;;  %v1572_v11 = vld [vmem:[%s2233_s5 + $0x34c] ss:$28 sps:$4 sm:$0xff]   ;;  %v1578_v15 = vld [vmem:[%s2233_s5 + $0x314] ss:$28 sps:$4 sm:$0xff]   ;;  %v1587_v20 = vld [vmem:[%s2233_s5 + $0x2e4] ss:$28 sps:$4 sm:$0xff]  }
  0x16   :  { %262 = vmatprep.subr.bf16.mxu1 %v1513_v21  ;;  %v1570_v13 = vld [vmem:[%s2233_s5 + $0x348] ss:$28 sps:$4 sm:$0xff]   ;;  %v1573_v14 = vld [vmem:[%s2233_s5 + $0x350] ss:$28 sps:$4 sm:$0xff]   ;;  %v1579_v18 = vld [vmem:[%s2233_s5 + $0x318] ss:$28 sps:$4 sm:$0xff]  }
  0x17   :  { %1477 = vmatpush3.bf16.msra.mxu0 %v1495_v16  ;;  %v1581_v16 = vld [vmem:[%s2233_s5 + $0x31c] ss:$28 sps:$4 sm:$0xff]   ;;  %v1576_v17 = vld [vmem:[%s2233_s5 + $0x310] ss:$28 sps:$4 sm:$0xff]  }
  0x18   :  { %1478 = vmatprep.subr.bf16.mxu0 %v1701_v2  ;;  %v1582_v21 = vld [vmem:[%s2233_s5 + $0x2d8] ss:$28 sps:$4 sm:$0xff]  }
  0x19   :  { %263 = vmatpush1.bf16.msra.mxu1 %v1515_v23  ;;  %v1590_v23 = vld [vmem:[%s2233_s5 + $0x2a4] ss:$28 sps:$4 sm:$0xff]  }
  0x1a   :  { %264 = vmatprep.subr.bf16.mxu1 %v1516_v29  ;;  %v1599_v29 = vld [vmem:[%s2233_s5 + $0x274] ss:$28 sps:$4 sm:$0xff]  }
  0x1b   :  { %1479 = vmatpush3.bf16.msra.mxu0 %v1496_v19  ;;  %v1584_v19 = vld [vmem:[%s2233_s5 + $0x2dc] ss:$28 sps:$4 sm:$0xff]  }
  0x1c   :  { %1480 = vmatprep.subr.bf16.mxu0 %v1701_v2 }
  0x1d   :  { %265 = vmatpush1.bf16.msra.mxu1 %v1518_v30  ;;  %v1594_v30 = vld [vmem:[%s2233_s5 + $0x268] ss:$28 sps:$4 sm:$0xff]  }
  0x1e   :  { %266 = vmatprep.subr.bf16.mxu1 %v1519_v31  ;;  %v1597_v31 = vld [vmem:[%s2233_s5 + $0x270] ss:$28 sps:$4 sm:$0xff]  }
  0x1f   :  { %1481 = vmatpush3.bf16.msra.mxu0 %v1497_v22  ;;  %v1585_v22 = vld [vmem:[%s2233_s5 + $0x2e0] ss:$28 sps:$4 sm:$0xff]  }
  0x20   :  { %1115 = vmatprep.subr.bf16.mxu0 %v1524_v42  ;;  %v1615_v42 = vld [vmem:[%s2233_s5 + $0x1c8] ss:$28 sps:$4 sm:$0xff]  }
  0x21   :  { %267 = vmatpush1.bf16.msra.mxu1 %v1521_v32  ;;  %v1602_v32 = vld [vmem:[%s2233_s5 + $0x234] ss:$28 sps:$4 sm:$0xff]  }
  0x22   :  { %1156 = vmatprep.subr.bf16.mxu1 %v1527_v45  ;;  %v1621_v45 = vld [vmem:[%s2233_s5 + $0x360] ss:$28 sps:$4 sm:$0xff]  }
  0x7f   :  { %v35_v26 = vpop.permute.xlu0 %34 }
  0x80   :  { %vm36_vm1 = vcmp.eq.s32.totalorder %v30_v25, %v35_v26  ;;  %v1593_v25 = vld [vmem:[%s2233_s5 + $0x2ac] ss:$28 sps:$4 sm:$0xff]   ;;  %v1588_v26 = vld [vmem:[%s2233_s5 + $0x2a0] ss:$28 sps:$4 sm:$0xff]  }
  0x81   :  { %vm37_vm2 = vmpackc.low %vm36_vm1, %vm36_vm1 }
  0x82   :  { %v38_v28 = vsel %vm37_vm2, 1065369472, %v31_v27  ;;  %v1591_v27 = vld [vmem:[%s2233_s5 + $0x2a8] ss:$28 sps:$4 sm:$0xff]  }
  0x83   :  { %1483 = vmatmul.mubr.bf16.vlgmr.msra.gmra.mxu0 %v38_v28  ;;  %v1596_v28 = vld [vmem:[%s2233_s5 + $0x26c] ss:$28 sps:$4 sm:$0xff]  }
  0x84   :  { %1116 = vmatpush1.bf16.msra.mxu0 %v1522_v43  ;;  %v1617_v43 = vld [vmem:[%s2233_s5 + $0x1cc] ss:$28 sps:$4 sm:$0xff]  }
  0x85   :  { %1117 = vmatprep.subr.bf16.mxu0 %v1530_v46  ;;  %v2033_v46 = vshrl.u32 %v29_v24, 7 }
  0x87   :  { %vm295_vm4 = vcmp.lt.s32.totalorder %v2033_v46, 4 }
  0x88   :  { %1118 = vmatpush1.bf16.msra.mxu0 %v1528_v48 }
  0x89   :  { %1119 = vmatprep.subr.bf16.mxu0 %v1536_v50 }
  0x8c   :  { %1120 = vmatpush1.bf16.msra.mxu0 %v1534_v52 }
  0x8d   :  { %1121 = vmatprep.subr.bf16.mxu0 %v1542_v54 }
  0x90   :  { %1122 = vmatpush1.bf16.msra.mxu0 %v1540_v56 }
  0x91   :  { %1123 = vmatprep.subr.bf16.mxu0 %v1548_v58 }
  0x94   :  { %1124 = vmatpush1.bf16.msra.mxu0 %v1546_v60 }
  0x95   :  { %1125 = vmatprep.subr.bf16.mxu0 %v1554_v62 }
  0x98   :  { %1126 = vmatpush1.bf16.msra.mxu0 %v1552_v0 }
  0x99   :  { %1127 = vmatprep.subr.bf16.mxu0 %v1560_v3 }
  0x9c   :  { %1128 = vmatpush1.bf16.msra.mxu0 %v1558_v5 }
  0x9d   :  { %1129 = vmatprep.subr.bf16.mxu0 %v1566_v7 }
  0xa0   :  { %1130 = vmatpush1.bf16.msra.mxu0 %v1564_v9 }
  0xa1   :  { %1131 = vmatprep.subr.bf16.mxu0 %v1572_v11 }
  0xa4   :  { %1132 = vmatpush2.bf16.msra.mxu0 %v1570_v13 }
  0xa5   :  { %1133 = vmatprep.subr.bf16.mxu0 %v1578_v15 }
  0xa8   :  { %1134 = vmatpush2.bf16.msra.mxu0 %v1576_v17 }
  0xa9   :  { %1135 = vmatprep.subr.bf16.mxu0 %v1584_v19 }
  0xac   :  { %1136 = vmatpush2.bf16.msra.mxu0 %v1582_v21 }
  0xad   :  { %1137 = vmatprep.subr.bf16.mxu0 %v1590_v23 }
  0xb0   :  { %1138 = vmatpush2.bf16.msra.mxu0 %v1588_v26  ;;  %v2038_v26 = vsub.s32 0, %v2033_v46 }
  0xb1   :  { %1139 = vmatprep.subr.bf16.mxu0 %v1596_v28  ;;  %v2044_v28 = vsub.s32 1, %v2033_v46 }
  0xb4   :  { %1140 = vmatpush2.bf16.msra.mxu0 %v1594_v30 }
  0xb5   :  { %1141 = vmatprep.subr.bf16.mxu0 %v1602_v32 }
 0x143   :  { %v146_v34 = vpop.f32.mrf.mxu0 }
 0x144   :  { %v147_v35 = vadd.f32 %v1297_v33, %v146_v34  ;;  %v1605_v33 = vld [vmem:[%s2233_s5 + $0x23c] ss:$28 sps:$4 sm:$0xff]   ;;  %v1600_v34 = vld [vmem:[%s2233_s5 + $0x230] ss:$28 sps:$4 sm:$0xff]  }
 0x145   :  { %v1484_v36 = vpop.f32.mrf.mxu0  ;;  %1142 = vmatpush2.bf16.msra.mxu0 %v1600_v34 }
 0x146   :  { %vm152_vm3 = vcmp.gt.f32.partialorder %v147_v35, 0.0  ;;  %v153_v37 = vmul.f32 0.2, %v147_v35  ;;  %v1608_v36 = vld [vmem:[%s2233_s5 + $0x1fc] ss:$28 sps:$4 sm:$0xff]  }
 0x147   :  { %v149_v38 = vpop.f32.mrf.mxu0  ;;  %1143 = vmatprep.subr.bf16.mxu0 %v1608_v36 }
 0x148   :  { %v154_v39 = vsel %vm152_vm3, %v147_v35, %v153_v37  ;;  %v1603_v35 = vld [vmem:[%s2233_s5 + $0x238] ss:$28 sps:$4 sm:$0xff]   ;;  %v1611_v37 = vld [vmem:[%s2233_s5 + $0x204] ss:$28 sps:$4 sm:$0xff]  }
 0x149   :  { %v1485_v40 = vpop.f32.mrf.mxu0  ;;  %v155_v41 = vpack.c.bf16 %v154_v39, %v154_v39  ;;  %v1606_v38 = vld [vmem:[%s2233_s5 + $0x1f8] ss:$28 sps:$4 sm:$0xff]   ;;  %v1609_v39 = vld [vmem:[%s2233_s5 + $0x200] ss:$28 sps:$4 sm:$0xff]  }
 0x14a   :  { %1144 = vmatpush2.bf16.msra.mxu0 %v1606_v38  ;;  %v1612_v40 = vld [vmem:[%s2233_s5 + $0x1c0] ss:$28 sps:$4 sm:$0xff]  }
 0x14b   :  { %285 = vmatmul.mubr.bf16.vlgmr.msra.gmra.mxu1 %v155_v41  ;;  %v1614_v41 = vld [vmem:[%s2233_s5 + $0x1c4] ss:$28 sps:$4 sm:$0xff]  }
 0x14c   :  { %1157 = vmatpush1.bf16.msra.mxu1 %v1525_v44  ;;  %1145 = vmatprep.subr.bf16.mxu0 %v1614_v41  ;;  %v1620_v44 = vld [vmem:[%s2233_s5 + $0x19c] ss:$28 sps:$4 sm:$0xff]  }
 0x14d   :  { %1158 = vmatprep.subr.bf16.mxu1 %v1533_v47  ;;  %v1322_v47 = vsel %vm295_vm4, 1.0, %v1701_v2 }
 0x14e   :  { %1146 = vmatpush2.bf16.msra.mxu0 %v1612_v40 }
 0x14f   :  { %1197 = vmatprep.subr.bf16.mxu0 %v1620_v44 }
 0x150   :  { %1159 = vmatpush1.bf16.msra.mxu1 %v1531_v49 }
 0x151   :  { %1160 = vmatprep.subr.bf16.mxu1 %v1539_v51 }
 0x154   :  { %1161 = vmatpush1.bf16.msra.mxu1 %v1537_v53 }
 0x155   :  { %1162 = vmatprep.subr.bf16.mxu1 %v1545_v55 }
 0x158   :  { %1163 = vmatpush1.bf16.msra.mxu1 %v1543_v57 }
 0x159   :  { %1164 = vmatprep.subr.bf16.mxu1 %v1551_v59 }
 0x15c   :  { %1165 = vmatpush1.bf16.msra.mxu1 %v1549_v61 }
 0x15d   :  { %1166 = vmatprep.subr.bf16.mxu1 %v1557_v63 }
 0x160   :  { %1167 = vmatpush1.bf16.msra.mxu1 %v1555_v1 }
 0x161   :  { %1168 = vmatprep.subr.bf16.mxu1 %v1563_v4 }
 0x164   :  { %1169 = vmatpush1.bf16.msra.mxu1 %v1561_v6 }
 0x165   :  { %1170 = vmatprep.subr.bf16.mxu1 %v1569_v8 }
 0x168   :  { %1171 = vmatpush1.bf16.msra.mxu1 %v1567_v10 }
 0x169   :  { %1172 = vmatprep.subr.bf16.mxu1 %v1575_v12 }
 0x16c   :  { %1173 = vmatpush2.bf16.msra.mxu1 %v1573_v14 }
 0x16d   :  { %1174 = vmatprep.subr.bf16.mxu1 %v1581_v16 }
 0x170   :  { %1175 = vmatpush2.bf16.msra.mxu1 %v1579_v18 }
 0x171   :  { %1176 = vmatprep.subr.bf16.mxu1 %v1587_v20 }
 0x174   :  { %1177 = vmatpush2.bf16.msra.mxu1 %v1585_v22 }
 0x175   :  { %1178 = vmatprep.subr.bf16.mxu1 %v1593_v25 }
 0x178   :  { %1179 = vmatpush2.bf16.msra.mxu1 %v1591_v27  ;;  %v40_v27 = vld [vmem:[%s2232_s3 + $0x1] sm:$0x3] }
 0x179   :  { %1180 = vmatprep.subr.bf16.mxu1 %v1599_v29  ;;  %v41_v29 = vld [vmem:[%s2232_s3 + $0x3] sm:$0x3]  ;;  %v344_v30 = vrot.slane %v40_v27, %v2038_v26  ;;  %v348_v32 = vrot.slane %v40_v27, %v2044_v28 }
 0x17a   :  { %v361_v36 = vrot.slane %v41_v29, %v2044_v28  ;;  %v1673_v27 = vld [vmem:[%s2233_s5 + $0x240] ss:$28 sps:$4 sm:$0xff]  }
 0x17c   :  { %1181 = vmatpush2.bf16.msra.mxu1 %v1597_v31 }
 0x17d   :  { %1182 = vmatprep.subr.bf16.mxu1 %v1605_v33  ;;  %v357_v33 = vrot.slane %v41_v29, %v2038_v26  ;;  %v1678_v29 = vld [vmem:[%s2233_s5 + $0x20c] ss:$28 sps:$4 sm:$0xff]  }
 0x180   :  { %1183 = vmatpush2.bf16.msra.mxu1 %v1603_v35 }
 0x181   :  { %1184 = vmatprep.subr.bf16.mxu1 %v1611_v37 }
 0x184   :  { %1185 = vmatpush2.bf16.msra.mxu1 %v1609_v39 }
 0x185   :  { %1186 = vmatprep.subr.bf16.mxu1 %v1617_v43 }
 0x188   :  { %1187 = vmatpush2.bf16.msra.mxu1 %v1615_v42 }
 0x189   :  { %1444 = vmatprep.subr.bf16.mxu1 %v1621_v45 }
 0x20b   :  { %v286_v48 = vpop.f32.mrf.mxu1 }
 0x20c   :  { %v298_v49 = vmul.f32 %v1322_v47, %v286_v48 }
 0x20d   :  { %v288_v50 = vpop.f32.mrf.mxu1 }
 0x20e   :  { %v300_v51 = vrot.slane %v298_v49, 4  ;;  %v299_v52 = vmul.f32 %v1322_v47, %v288_v50 }
 0x20f   :  { %v290_v53 = vpop.f32.mrf.mxu1 }
 0x210   :  { %v301_v54 = vadd.f32 %v300_v51, %v298_v49  ;;  %v306_v55 = vrot.slane %v299_v52, 4  ;;  %v1622_v49 = vld [vmem:[%s2233_s5 + $0x1a0] ss:$28 sps:$4 sm:$0xff]  }
 0x211   :  { %v291_v56 = vpop.f32.mrf.mxu1  ;;  %v1625_v51 = vld [vmem:[%s2233_s5 + $0x164] ss:$28 sps:$4 sm:$0xff]  }
 0x212   :  { %v302_v57 = vrot.slane %v301_v54, 2  ;;  %v307_v58 = vadd.f32 %v306_v55, %v299_v52  ;;  %v1626_v52 = vld [vmem:[%s2233_s5 + $0x328] ss:$28 sps:$4 sm:$0xff]   ;;  %v1623_v53 = vld [vmem:[%s2233_s5 + $0x160] ss:$28 sps:$4 sm:$0xff]  }
 0x213   :  { %v1630_v55 = vld [vmem:[%s2233_s5 + $0x12c] ss:$28 sps:$4 sm:$0xff]  }
 0x214   :  { %v303_v59 = vadd.f32 %v302_v57, %v301_v54  ;;  %v308_v60 = vrot.slane %v307_v58, 2  ;;  %v1627_v54 = vld [vmem:[%s2233_s5 + $0x168] ss:$28 sps:$4 sm:$0xff]   ;;  %v1631_v56 = vld [vmem:[%s2233_s5 + $0x2f0] ss:$28 sps:$4 sm:$0xff]  }
 0x215   :  { %v1628_v57 = vld [vmem:[%s2233_s5 + $0x128] ss:$28 sps:$4 sm:$0xff]  }
 0x216   :  { %v304_v61 = vrot.slane %v303_v59, 1  ;;  %v309_v24 = vadd.f32 %v308_v60, %v307_v58  ;;  %v1632_v58 = vld [vmem:[%s2233_s5 + $0x130] ss:$28 sps:$4 sm:$0xff]   ;;  %v1636_v60 = vld [vmem:[%s2233_s5 + $0x2b8] ss:$28 sps:$4 sm:$0xff]  }
 0x218   :  { %v305_v62 = vadd.f32 %v304_v61, %v303_v59  ;;  %v310_v63 = vrot.slane %v309_v24, 1  ;;  %v1635_v59 = vld [vmem:[%s2233_s5 + $0xf4] ss:$28 sps:$4 sm:$0xff]  }
 0x219   :  { %v1633_v61 = vld [vmem:[%s2233_s5 + $0xf0] ss:$28 sps:$4 sm:$0xff]  }
 0x21a   :  { %v312_v0 = vmul.f32 0.25, %v305_v62  ;;  %v311_v1 = vadd.f32 %v310_v63, %v309_v24  ;;  %v1637_v24 = vld [vmem:[%s2233_s5 + $0xf8] ss:$28 sps:$4 sm:$0xff]   ;;  %v1641_v63 = vld [vmem:[%s2233_s5 + $0x280] ss:$28 sps:$4 sm:$0xff]  }
 0x21b   :  { %v1640_v62 = vld [vmem:[%s2233_s5 + $0xbc] ss:$28 sps:$4 sm:$0xff]  }
 0x21c   :  { %v314_v2 = vsub.f32 %v286_v48, %v312_v0  ;;  %v313_v3 = vmul.f32 0.25, %v311_v1  ;;  %v1618_v48 = vld [vmem:[%s2233_s5 + $0x198] ss:$28 sps:$4 sm:$0xff]   ;;  %v1642_v1 = vld [vmem:[%s2233_s5 + $0xc0] ss:$28 sps:$4 sm:$0xff]  }
 0x21d   :  { %v1638_v0 = vld [vmem:[%s2233_s5 + $0xb8] ss:$28 sps:$4 sm:$0xff]  }
 0x21e   :  { %v316_v4 = vmul.f32 %v1322_v47, %v314_v2  ;;  %v315_v5 = vsub.f32 %v288_v50, %v313_v3  ;;  %v1646_v3 = vld [vmem:[%s2233_s5 + $0x248] ss:$28 sps:$4 sm:$0xff]  }
 0x220   :  { %v318_v6 = vmul.f32 %v316_v4, %v316_v4  ;;  %v317_v7 = vmul.f32 %v1322_v47, %v315_v5  ;;  %v1643_v4 = vld [vmem:[%s2233_s5 + $0x80] ss:$28 sps:$4 sm:$0xff]  }
 0x222   :  { %v320_v8 = vrot.slane %v318_v6, 4  ;;  %v319_v9 = vmul.f32 %v317_v7, %v317_v7  ;;  %v1651_v7 = vld [vmem:[%s2233_s5 + $0x210] ss:$28 sps:$4 sm:$0xff]  }
 0x224   :  { %v321_v10 = vadd.f32 %v320_v8, %v318_v6  ;;  %v326_v11 = vrot.slane %v319_v9, 4  ;;  %v1650_v6 = vld [vmem:[%s2233_s5 + $0x4c] ss:$28 sps:$4 sm:$0xff]  }
 0x225   :  { %v1648_v8 = vld [vmem:[%s2233_s5 + $0x48] ss:$28 sps:$4 sm:$0xff]  }
 0x226   :  { %v322_v12 = vrot.slane %v321_v10, 2  ;;  %v327_v13 = vadd.f32 %v326_v11, %v319_v9  ;;  %v1652_v9 = vld [vmem:[%s2233_s5 + $0x50] ss:$28 sps:$4 sm:$0xff]   ;;  %v1656_v11 = vld [vmem:[%s2233_s5 + $0x1d8] ss:$28 sps:$4 sm:$0xff]  }
 0x228   :  { %v323_v14 = vadd.f32 %v322_v12, %v321_v10  ;;  %v328_v15 = vrot.slane %v327_v13, 2  ;;  %v1655_v10 = vld [vmem:[%s2233_s5 + $0x14] ss:$28 sps:$4 sm:$0xff]  }
 0x229   :  { %v1653_v12 = vld [vmem:[%s2233_s5 + $0x10] ss:$28 sps:$4 sm:$0xff]  }
 0x22a   :  { %v324_v16 = vrot.slane %v323_v14, 1  ;;  %v329_v17 = vadd.f32 %v328_v15, %v327_v13  ;;  %v1657_v13 = vld [vmem:[%s2233_s5 + $0x18] ss:$28 sps:$4 sm:$0xff]  }
 0x22b   :  { %v1658_v15 = vld [vmem:[%s2233_s5 + $0x358] ss:$28 sps:$4 sm:$0xff]  }
 0x22c   :  { %v325_v18 = vadd.f32 %v324_v16, %v323_v14  ;;  %v330_v19 = vrot.slane %v329_v17, 1  ;;  %v1660_v14 = vld [vmem:[%s2233_s5 + $0x35c] ss:$28 sps:$4 sm:$0xff]   ;;  %v1663_v16 = vld [vmem:[%s2233_s5 + $0x324] ss:$28 sps:$4 sm:$0xff]  }
 0x22e   :  { %v332_v20 = vmul.f32 0.25, %v325_v18  ;;  %v331_v21 = vadd.f32 %v330_v19, %v329_v17  ;;  %v1661_v17 = vld [vmem:[%s2233_s5 + $0x320] ss:$28 sps:$4 sm:$0xff]   ;;  %v1666_v18 = vld [vmem:[%s2233_s5 + $0x2ec] ss:$28 sps:$4 sm:$0xff]  }
 0x22f   :  { %v1664_v19 = vld [vmem:[%s2233_s5 + $0x2e8] ss:$28 sps:$4 sm:$0xff]  }
 0x230   :  { %v334_v22 = vadd.f32 1e-05, %v332_v20  ;;  %v333_v23 = vmul.f32 0.25, %v331_v21  ;;  %v1669_v20 = vld [vmem:[%s2233_s5 + $0x2b4] ss:$28 sps:$4 sm:$0xff]  }
 0x231   :  { %v1667_v21 = vld [vmem:[%s2233_s5 + $0x2b0] ss:$28 sps:$4 sm:$0xff]  }
 0x232   :  { %1682 = vrsqrt.f32 %v334_v22  ;;  %v335_v25 = vadd.f32 1e-05, %v333_v23  ;;  %v1672_v22 = vld [vmem:[%s2233_s5 + $0x27c] ss:$28 sps:$4 sm:$0xff]  }
 0x233   :  { %v1670_v23 = vld [vmem:[%s2233_s5 + $0x278] ss:$28 sps:$4 sm:$0xff]  }
 0x234   :  { %1684 = vrsqrt.f32 %v335_v25  ;;  %v1675_v25 = vld [vmem:[%s2233_s5 + $0x244] ss:$28 sps:$4 sm:$0xff]  }
 0x23f   :  { %v1683_v31 = vpop.eup %1682 }
 0x240   :  { %v338_v34 = vmul.f32 %v1683_v31, %v314_v2  ;;  %v1645_v2 = vld [vmem:[%s2233_s5 + $0x84] ss:$28 sps:$4 sm:$0xff]   ;;  %v1681_v31 = vld [vmem:[%s2233_s5 + $0x1d4] ss:$28 sps:$4 sm:$0xff]  }
 0x241   :  { %v1685_v35 = vpop.eup %1684 }
 0x242   :  { %v351_v37 = vmul.f32 %v344_v30, %v338_v34  ;;  %v339_v38 = vmul.f32 %v1685_v35, %v315_v5  ;;  %v1647_v5 = vld [vmem:[%s2233_s5 + $0x88] ss:$28 sps:$4 sm:$0xff]   ;;  %v518_v35 = vsub.s32 3, %v2033_v46 }
 0x243   :  { %v1676_v30 = vld [vmem:[%s2233_s5 + $0x208] ss:$28 sps:$4 sm:$0xff]  }
 0x244   :  { %v364_v39 = vadd.f32 %v357_v33, %v351_v37  ;;  %v352_v40 = vmul.f32 %v348_v32, %v339_v38  ;;  %v1679_v32 = vld [vmem:[%s2233_s5 + $0x1d0] ss:$28 sps:$4 sm:$0xff]   ;;  %v514_v33 = vsub.s32 2, %v2033_v46  ;;  %v502_v34 = vld [vmem:[%s2234_s6] sm:$0x7f] }
 0x245   :  { %v511_v38 = vrot.slane %v502_v34, %v2044_v28 }
 0x246   :  { %v365_v41 = vadd.f32 %v361_v36, %v352_v40  ;;  %vm366_vm5 = vcmp.gt.f32.partialorder %v364_v39, 0.0  ;;  %v368_v42 = vmul.f32 0.2, %v364_v39  ;;  %v507_v36 = vrot.slane %v502_v34, %v2038_v26 }
 0x247   :  { %v515_v37 = vrot.slane %v502_v34, %v514_v33 }
 0x248   :  { %vm367_vm6 = vcmp.gt.f32.partialorder %v365_v41, 0.0  ;;  %v369_v43 = vmul.f32 0.2, %v365_v41  ;;  %v370_v44 = vsel %vm366_vm5, %v364_v39, %v368_v42  ;;  %v519_v39 = vrot.slane %v502_v34, %v518_v35 }
 0x249   :  { %v2059_v50 = vpack.c.bf16 %v370_v44, %v370_v44 }
 0x24a   :  { %v371_v45 = vsel %vm367_vm6, %v365_v41, %v369_v43 }
 0x24b   :  { %v373_v47 = vpack.c.bf16 %v371_v45, %v371_v45 }
 0x24d   :  { %1147 = vmatprep.mubr.bf16.mxu0 %v373_v47  ;;  %1188 = vmatprep.mubr.bf16.mxu1 %v373_v47 }
 0x24e   :  { %1148 = vmatmul.mubr.bf16.vlgmr.msra.gmra.mxu0 %v2059_v50  ;;  %1189 = vmatmul.mubr.bf16.vlgmr.msra.gmra.mxu1 %v2059_v50 }
 0x24f   :  { %1198 = vmatpush1.bf16.msra.mxu0 %v1618_v48  ;;  %1445 = vmatpush3.bf16.msra.mxu1 %v1622_v49 }
 0x250   :  { %1229 = vmatprep.mubr.bf16.mxu0 %v373_v47  ;;  %1270 = vmatprep.mubr.bf16.mxu1 %v373_v47 }
 0x251   :  { %1199 = vmatprep.subr.bf16.mxu0 %v1625_v51  ;;  %1446 = vmatprep.subr.bf16.mxu1 %v1626_v52 }
 0x253   :  { %1200 = vmatpush1.bf16.msra.mxu0 %v1623_v53  ;;  %1447 = vmatpush3.bf16.msra.mxu1 %v1627_v54 }
 0x254   :  { %1201 = vmatprep.subr.bf16.mxu0 %v1630_v55  ;;  %1448 = vmatprep.subr.bf16.mxu1 %v1631_v56  ;;  %v530_v55 = vsub.s32 6, %v2033_v46 }
 0x257   :  { %1202 = vmatpush1.bf16.msra.mxu0 %v1628_v57  ;;  %1449 = vmatpush3.bf16.msra.mxu1 %v1632_v58  ;;  %v531_v57 = vrot.slane %v502_v34, %v530_v55 }
 0x258   :  { %1203 = vmatprep.subr.bf16.mxu0 %v1635_v59  ;;  %1450 = vmatprep.subr.bf16.mxu1 %v1636_v60 }
 0x25b   :  { %1204 = vmatpush1.bf16.msra.mxu0 %v1633_v61  ;;  %1451 = vmatpush3.bf16.msra.mxu1 %v1637_v24 }
 0x25c   :  { %1205 = vmatprep.subr.bf16.mxu0 %v1640_v62  ;;  %1452 = vmatprep.subr.bf16.mxu1 %v1641_v63  ;;  %v522_v63 = vsub.s32 4, %v2033_v46 }
 0x25f   :  { %1206 = vmatpush1.bf16.msra.mxu0 %v1638_v0  ;;  %1453 = vmatpush3.bf16.msra.mxu1 %v1642_v1  ;;  %v526_v0 = vsub.s32 5, %v2033_v46  ;;  %v523_v1 = vrot.slane %v502_v34, %v522_v63 }
 0x260   :  { %1207 = vmatprep.subr.bf16.mxu0 %v1645_v2  ;;  %1454 = vmatprep.subr.bf16.mxu1 %v1646_v3 }
 0x261   :  { %v527_v2 = vrot.slane %v502_v34, %v526_v0 }
 0x263   :  { %1208 = vmatpush1.bf16.msra.mxu0 %v1643_v4  ;;  %1455 = vmatpush3.bf16.msra.mxu1 %v1647_v5 }
 0x264   :  { %1209 = vmatprep.subr.bf16.mxu0 %v1650_v6  ;;  %1456 = vmatprep.subr.bf16.mxu1 %v1651_v7 }
 0x267   :  { %1210 = vmatpush1.bf16.msra.mxu0 %v1648_v8  ;;  %1457 = vmatpush3.bf16.msra.mxu1 %v1652_v9 }
 0x268   :  { %1211 = vmatprep.subr.bf16.mxu0 %v1655_v10  ;;  %1458 = vmatprep.subr.bf16.mxu1 %v1656_v11 }
 0x26b   :  { %1212 = vmatpush1.bf16.msra.mxu0 %v1653_v12  ;;  %1459 = vmatpush3.bf16.msra.mxu1 %v1657_v13 }
 0x26c   :  { %1213 = vmatprep.subr.bf16.mxu0 %v1660_v14 }
 0x26e   :  { %1271 = vmatmul.mubr.bf16.vlgmr.msra.gmra.mxu1 %v2059_v50 }
 0x26f   :  { %1214 = vmatpush2.bf16.msra.mxu0 %v1658_v15 }
 0x270   :  { %1215 = vmatprep.subr.bf16.mxu0 %v1663_v16 }
 0x273   :  { %1216 = vmatpush2.bf16.msra.mxu0 %v1661_v17 }
 0x274   :  { %1217 = vmatprep.subr.bf16.mxu0 %v1666_v18 }
 0x277   :  { %1218 = vmatpush2.bf16.msra.mxu0 %v1664_v19 }
 0x278   :  { %1219 = vmatprep.subr.bf16.mxu0 %v1669_v20 }
 0x27b   :  { %1220 = vmatpush2.bf16.msra.mxu0 %v1667_v21 }
 0x27c   :  { %1221 = vmatprep.subr.bf16.mxu0 %v1672_v22 }
 0x27f   :  { %1222 = vmatpush2.bf16.msra.mxu0 %v1670_v23 }
 0x280   :  { %1223 = vmatprep.subr.bf16.mxu0 %v1675_v25 }
 0x283   :  { %1224 = vmatpush2.bf16.msra.mxu0 %v1673_v27 }
 0x284   :  { %1225 = vmatprep.subr.bf16.mxu0 %v1678_v29 }
 0x287   :  { %1226 = vmatpush2.bf16.msra.mxu0 %v1676_v30 }
 0x288   :  { %1227 = vmatprep.subr.bf16.mxu0 %v1681_v31 }
 0x28b   :  { %1228 = vmatpush2.bf16.msra.mxu0 %v1679_v32 }
 0x28e   :  { %1230 = vmatmul.mubr.bf16.vlgmr.msra.gmra.mxu0 %v2059_v50 }
 0x30e   :  { %v1149_v40 = vpop.f32.mrf.mxu0  ;;  %v1190_v41 = vpop.f32.mrf.mxu1 }
 0x30f   :  { %v1150_v42 = vadd.f32 %v1149_v40, %v507_v36  ;;  %v1191_v43 = vadd.f32 %v1190_v41, %v515_v37 }
 0x310   :  { %v1151_v44 = vpop.f32.mrf.mxu0  ;;  %v1192_v45 = vpop.f32.mrf.mxu1 }
 0x311   :  { %1686 = vtanh.f32 %v1150_v42  ;;  %v1152_v47 = vadd.f32 %v1151_v44, %v511_v38  ;;  %v1193_v48 = vadd.f32 %v1192_v45, %v519_v39 }
 0x312   :  { %1688 = vtanh.f32 %v1191_v43  ;;  %v1153_v49 = vpop.f32.mrf.mxu0  ;;  %v1194_v50 = vpop.f32.mrf.mxu1 }
 0x313   :  { %1690 = vtanh.f32 %v1152_v47 }
 0x314   :  { %1692 = vtanh.f32 %v1193_v48  ;;  %v1154_v51 = vpop.f32.mrf.mxu0  ;;  %v1195_v26 = vpop.f32.mrf.mxu1 }
 0x31e   :  { %v1687_v52 = vpop.eup %1686 }
 0x31f   :  { %v1689_v53 = vpop.eup %1688  ;;  %1285 = vst [vmem:[%s2235_s7] sm:$0xff] %v1687_v52 }
 0x320   :  { %v1691_v28 = vpop.eup %1690  ;;  %1287 = vst [vmem:[%s2235_s7 + $0x10] sm:$0xff] %v1689_v53 }
 0x321   :  { %v1693_v54 = vpop.eup %1692  ;;  %1286 = vst [vmem:[%s2235_s7 + $0x8] sm:$0xff] %v1691_v28 }
 0x322   :  { %1288 = vst [vmem:[%s2235_s7 + $0x18] sm:$0xff] %v1693_v54 }
 0x32e   :  { %v1460_v56 = vpop.f32.mrf.mxu1 }
 0x330   :  { %v1461_v58 = vpop.f32.mrf.mxu1 }
 0x331   :  { %v1462_v59 = vadd.f32 %v1461_v58, %v1460_v56 }
 0x332   :  { %v1463_v60 = vpop.f32.mrf.mxu1 }
 0x333   :  { %v1273_v61 = vadd.f32 %v1462_v59, %v531_v57 }
 0x334   :  { %v1464_v24 = vpop.f32.mrf.mxu1 }
 0x335   :  { %1694 = vtanh.f32 %v1273_v61 }
 0x342   :  { %v1695_v62 = vpop.eup %1694 }
 0x343   :  { %1292 = vst.msk [vmem:[%s2235_s7 + $0x30] sm:$0xff] %vm1291_vm7, %v1695_v62 }
 0x34e   :  { %v1231_v3 = vpop.f32.mrf.mxu0 }
 0x34f   :  { %v1232_v4 = vadd.f32 %v1231_v3, %v523_v1 }
 0x350   :  { %v1233_v5 = vpop.f32.mrf.mxu0 }
 0x351   :  { %1696 = vtanh.f32 %v1232_v4  ;;  %v1234_v6 = vadd.f32 %v1233_v5, %v527_v2 }
 0x352   :  { %v1235_v7 = vpop.f32.mrf.mxu0 }
 0x353   :  { %1698 = vtanh.f32 %v1234_v6 }
 0x354   :  { %v1236_v8 = vpop.f32.mrf.mxu0 }
 0x35e   :  { %v1697_v9 = vpop.eup %1696 }
 0x35f   :  { %1289 = vst [vmem:[%s2235_s7 + $0x20] sm:$0xff] %v1697_v9 }
 0x360   :  { %v1699_v10 = vpop.eup %1698 }
 0x361   :  { %1290 = vst [vmem:[%s2235_s7 + $0x28] sm:$0xff] %v1699_v10 }

</bundles_post_ra>
